<compile_context>
chip_gen: v7x
topology: tpu7x:2x2x1
jax: 0.10.0
libtpu: 0.0.40
codegen_flags: <defaults>
</compile_context>

<pallas_src>
import functools

import jax
import jax.numpy as jnp
from jax.experimental import pallas as pl
from jax.experimental.pallas import tpu as pltpu


def _mlp_kernel(n_layers, *refs):
    """refs = (x_ref, w0t, b0, w1t, b1, ..., out_ref).

    Transposed layout: x_ref is (in_dim_p, TILE_B), weights are pre-transposed
    to (out_i, in_i), biases are (out_i, 1) and broadcast over the lane axis.
    """
    x_ref = refs[0]
    out_ref = refs[-1]
    param_refs = refs[1:-1]
    assert len(param_refs) == 2 * n_layers

    h = x_ref[...]  # (in_dim_p, TILE_B) float32, batch on lanes
    for i in range(n_layers):
        wt = param_refs[2 * i][...]        # (out_i, in_i)
        b = param_refs[2 * i + 1][...]     # (out_i, 1)
        h = jnp.dot(wt, h, preferred_element_type=jnp.float32) + b
        if i < n_layers - 1:
            h = jnp.maximum(h, 0.0)        # nn.ReLU between hidden Linears
    out_ref[...] = h.astype(out_ref.dtype)


def softmax_net_forward(x, params, *, tile_b=256):
    """Run the SoftmaxNet chain: Linear (+ReLU) * len(hidden) + final Linear.

    Args:
      x: (batch, input_dim) float32.
      params: list of (W, b) with W: (in, out), b: (1, out)  [PyTorch Linear
              weights transposed once here in the wrapper].
      tile_b: batch tile (lane) size; must be a multiple of 128.
    Returns:
      (batch, n_classes) float32 logits.
    """
    batch, in_dim = x.shape
    n_layers = len(params)
    n_out = params[-1][0].shape[1]

    # Pad the contraction dim to a sublane multiple and the batch to tile_b.
    in_dim_p = -(-in_dim // 8) * 8
    b_pad = -(-batch // tile_b) * tile_b

    # Batch on the lane (last) axis: (in_dim_p, b_pad).
    x_t = jnp.pad(x.astype(jnp.float32),
                  ((0, b_pad - batch), (0, in_dim_p - in_dim))).T

    flat = []
    layer_dims = []
    for li, (w, b) in enumerate(params):
        w = w.astype(jnp.float32)
        b = b.astype(jnp.float32)
        if li == 0 and in_dim_p != in_dim:
            w = jnp.pad(w, ((0, in_dim_p - in_dim), (0, 0)))  # zero rows
        wt = w.T                  # (out, in)
        bt = b.reshape(-1, 1)     # (out, 1) -> broadcasts over lanes
        flat.extend([wt, bt])
        layer_dims.append((wt.shape[1], wt.shape[0]))

    grid = (b_pad // tile_b,)

    # Activations / output tiled over batch; weights & biases VMEM-resident.
    in_specs = [pl.BlockSpec((in_dim_p, tile_b), lambda i: (0, i))]
    for wt, bt in zip(flat[0::2], flat[1::2]):
        in_specs.append(pl.BlockSpec(wt.shape, lambda i: (0, 0)))
        in_specs.append(pl.BlockSpec(bt.shape, lambda i: (0, 0)))
    out_spec = pl.BlockSpec((n_out, tile_b), lambda i: (0, i))

    flops = 2 * batch * sum(i * o for i, o in layer_dims)
    bytes_accessed = (x_t.size * 4
                      + sum(a.size * 4 for a in flat)
                      + n_out * b_pad * 4)

    kernel = functools.partial(_mlp_kernel, n_layers)
    out_t = pl.pallas_call(
        kernel,
        out_shape=jax.ShapeDtypeStruct((n_out, b_pad), jnp.float32),
        grid=grid,
        in_specs=in_specs,
        out_specs=out_spec,
        compiler_params=pltpu.CompilerParams(
            dimension_semantics=("parallel",)),
        cost_estimate=pl.CostEstimate(
            flops=flops, bytes_accessed=bytes_accessed, transcendentals=0),
    )(x_t, *flat)

    # Back to (batch, n_classes); drop batch padding.
    return out_t.T[:batch]


def init_params(key, input_dim, hidden, n_classes):
    """Deterministic parameter init mimicking nn.Linear shapes (stored (in, out))."""
    dims = [input_dim, *hidden, n_classes]
    params = []
    for i in range(len(dims) - 1):
        key, kw, kb = jax.random.split(key, 3)
        bound = 1.0 / jnp.sqrt(dims[i])
        w = jax.random.uniform(kw, (dims[i], dims[i + 1]), jnp.float32, -bound, bound)
        b = jax.random.uniform(kb, (1, dims[i + 1]), jnp.float32, -bound, bound)
        params.append((w, b))
    return params


def reference_forward(x, params):
    h = x
    for i, (w, b) in enumerate(params):
        h = h @ w + b
        if i < len(params) - 1:
            h = jnp.maximum(h, 0.0)
    return h


if __name__ == "__main__":
    # SoftmaxNet(input_dim=15, n_classes=2, hidden=(32, 16))
    input_dim = 15
    n_classes = 2
    hidden = (32, 16)
    batch = 300          # pads to 512 with tile_b=256 -> 2 grid steps

    key = jax.random.PRNGKey(0)
    key, kx = jax.random.split(key)
    x = jax.random.normal(kx, (batch, input_dim), jnp.float32)
    params = init_params(key, input_dim, hidden, n_classes)

    out = softmax_net_forward(x, params, tile_b=256)
    out = jax.block_until_ready(out)

    ref = reference_forward(x, params)
    assert out.shape == (batch, n_classes)
    assert jnp.allclose(out, ref, atol=1e-4, rtol=1e-4), "mismatch vs JAX reference"

    # TODO(synk): LogSoftmax/NLLLoss are module attributes but are not applied
    # in forward(), so they are intentionally not part of the kernel.
    print("KERNEL_OK")
</pallas_src>

<mosaic_0001>
module attributes {stable_mosaic.version = 11 : i64} {
  func.func @_mlp_kernel(%arg0: i32, %arg1: memref<16x256xf32, #tpu.memory_space<vmem>>, %arg2: memref<32x16xf32, #tpu.memory_space<vmem>>, %arg3: memref<32x1xf32, #tpu.memory_space<vmem>>, %arg4: memref<16x32xf32, #tpu.memory_space<vmem>>, %arg5: memref<16x1xf32, #tpu.memory_space<vmem>>, %arg6: memref<2x16xf32, #tpu.memory_space<vmem>>, %arg7: memref<2x1xf32, #tpu.memory_space<vmem>>, %arg8: memref<2x256xf32, #tpu.memory_space<vmem>>) attributes {dimension_semantics = [#tpu.dimension_semantics<parallel>], iteration_bounds = array<i64: 2>, scalar_prefetch = 0 : i64, scratch_operands = 0 : i64, tpu.core_type = #tpu.core_type<tc>, window_params = [{transform_indices = @transform_0, window_bounds = array<i64: 16, 256>}, {pipeline_mode = #tpu.pipeline_mode<synchronous>, transform_indices = @transform_1, window_bounds = array<i64: 32, 16>}, {pipeline_mode = #tpu.pipeline_mode<synchronous>, transform_indices = @transform_2, window_bounds = array<i64: 32, 1>}, {pipeline_mode = #tpu.pipeline_mode<synchronous>, transform_indices = @transform_3, window_bounds = array<i64: 16, 32>}, {pipeline_mode = #tpu.pipeline_mode<synchronous>, transform_indices = @transform_4, window_bounds = array<i64: 16, 1>}, {pipeline_mode = #tpu.pipeline_mode<synchronous>, transform_indices = @transform_5, window_bounds = array<i64: 2, 16>}, {pipeline_mode = #tpu.pipeline_mode<synchronous>, transform_indices = @transform_6, window_bounds = array<i64: 2, 1>}, {transform_indices = @transform_7, window_bounds = array<i64: 2, 256>}]} {
    %c0 = arith.constant 0 : index
    %c0_0 = arith.constant 0 : index
    %0 = vector.load %arg1[%c0, %c0_0] : memref<16x256xf32, #tpu.memory_space<vmem>>, vector<16x256xf32>
    %c0_1 = arith.constant 0 : index
    %c0_2 = arith.constant 0 : index
    %1 = vector.load %arg2[%c0_1, %c0_2] : memref<32x16xf32, #tpu.memory_space<vmem>>, vector<32x16xf32>
    %c0_3 = arith.constant 0 : index
    %c0_4 = arith.constant 0 : index
    %2 = vector.load %arg3[%c0_3, %c0_4] : memref<32x1xf32, #tpu.memory_space<vmem>>, vector<32x1xf32>
    %cst = arith.constant dense<0.000000e+00> : vector<32x256xf32>
    %3 = tpu.matmul %1, %0, %cst {dimension_numbers = #tpu.dot_dimension_numbers<[1], [0], [0], [1], [0, 0, 1, 1], [], []>} : vector<32x16xf32>, vector<16x256xf32>, vector<32x256xf32> -> vector<32x256xf32>
    %4 = vector.broadcast %2 : vector<32x1xf32> to vector<32x256xf32>
    %5 = arith.addf %3, %4 : vector<32x256xf32>
    %cst_5 = arith.constant 0.000000e+00 : f32
    %6 = vector.broadcast %cst_5 : f32 to vector<32x256xf32>
    %7 = arith.maximumf %5, %6 : vector<32x256xf32>
    %c0_6 = arith.constant 0 : index
    %c0_7 = arith.constant 0 : index
    %8 = vector.load %arg4[%c0_6, %c0_7] : memref<16x32xf32, #tpu.memory_space<vmem>>, vector<16x32xf32>
    %c0_8 = arith.constant 0 : index
    %c0_9 = arith.constant 0 : index
    %9 = vector.load %arg5[%c0_8, %c0_9] : memref<16x1xf32, #tpu.memory_space<vmem>>, vector<16x1xf32>
    %cst_10 = arith.constant dense<0.000000e+00> : vector<16x256xf32>
    %10 = tpu.matmul %8, %7, %cst_10 {dimension_numbers = #tpu.dot_dimension_numbers<[1], [0], [0], [1], [0, 0, 1, 1], [], []>} : vector<16x32xf32>, vector<32x256xf32>, vector<16x256xf32> -> vector<16x256xf32>
    %11 = vector.broadcast %9 : vector<16x1xf32> to vector<16x256xf32>
    %12 = arith.addf %10, %11 : vector<16x256xf32>
    %cst_11 = arith.constant 0.000000e+00 : f32
    %13 = vector.broadcast %cst_11 : f32 to vector<16x256xf32>
    %14 = arith.maximumf %12, %13 : vector<16x256xf32>
    %c0_12 = arith.constant 0 : index
    %c0_13 = arith.constant 0 : index
    %15 = vector.load %arg6[%c0_12, %c0_13] : memref<2x16xf32, #tpu.memory_space<vmem>>, vector<2x16xf32>
    %c0_14 = arith.constant 0 : index
    %c0_15 = arith.constant 0 : index
    %16 = vector.load %arg7[%c0_14, %c0_15] : memref<2x1xf32, #tpu.memory_space<vmem>>, vector<2x1xf32>
    %cst_16 = arith.constant dense<0.000000e+00> : vector<2x256xf32>
    %17 = tpu.matmul %15, %14, %cst_16 {dimension_numbers = #tpu.dot_dimension_numbers<[1], [0], [0], [1], [0, 0, 1, 1], [], []>} : vector<2x16xf32>, vector<16x256xf32>, vector<2x256xf32> -> vector<2x256xf32>
    %18 = vector.broadcast %16 : vector<2x1xf32> to vector<2x256xf32>
    %19 = arith.addf %17, %18 : vector<2x256xf32>
    %c0_17 = arith.constant 0 : index
    %c0_18 = arith.constant 0 : index
    %20 = vector.load %arg8[%c0_17, %c0_18] : memref<2x256xf32, #tpu.memory_space<vmem>>, vector<2x256xf32>
    tpu.vector_store %arg8[%c0_17, %c0_18], %19 {strides = array<i32>} : memref<2x256xf32, #tpu.memory_space<vmem>>, vector<2x256xf32>,
    return
  }
  func.func @transform_0(%arg0: i32) -> (i32, i32) {
    %c0_i32 = arith.constant 0 : i32
    %c0_i32_0 = arith.constant 0 : i32
    return %c0_i32, %arg0 : i32, i32
  }
  func.func @transform_1(%arg0: i32) -> (i32, i32) {
    %c0_i32 = arith.constant 0 : i32
    %c0_i32_0 = arith.constant 0 : i32
    %c0_i32_1 = arith.constant 0 : i32
    return %c0_i32, %c0_i32_0 : i32, i32
  }
  func.func @transform_2(%arg0: i32) -> (i32, i32) {
    %c0_i32 = arith.constant 0 : i32
    %c0_i32_0 = arith.constant 0 : i32
    %c0_i32_1 = arith.constant 0 : i32
    return %c0_i32, %c0_i32_0 : i32, i32
  }
  func.func @transform_3(%arg0: i32) -> (i32, i32) {
    %c0_i32 = arith.constant 0 : i32
    %c0_i32_0 = arith.constant 0 : i32
    %c0_i32_1 = arith.constant 0 : i32
    return %c0_i32, %c0_i32_0 : i32, i32
  }
  func.func @transform_4(%arg0: i32) -> (i32, i32) {
    %c0_i32 = arith.constant 0 : i32
    %c0_i32_0 = arith.constant 0 : i32
    %c0_i32_1 = arith.constant 0 : i32
    return %c0_i32, %c0_i32_0 : i32, i32
  }
  func.func @transform_5(%arg0: i32) -> (i32, i32) {
    %c0_i32 = arith.constant 0 : i32
    %c0_i32_0 = arith.constant 0 : i32
    %c0_i32_1 = arith.constant 0 : i32
    return %c0_i32, %c0_i32_0 : i32, i32
  }
  func.func @transform_6(%arg0: i32) -> (i32, i32) {
    %c0_i32 = arith.constant 0 : i32
    %c0_i32_0 = arith.constant 0 : i32
    %c0_i32_1 = arith.constant 0 : i32
    return %c0_i32, %c0_i32_0 : i32, i32
  }
  func.func @transform_7(%arg0: i32) -> (i32, i32) {
    %c0_i32 = arith.constant 0 : i32
    %c0_i32_0 = arith.constant 0 : i32
    return %c0_i32, %arg0 : i32, i32
  }
}

</mosaic_0001>

<bundles_post_ra>
// kernel: tpu_custom_call.1
= control target key start
LH: loop header
LB: loop body
LE: loop exit
PB: predicated region body
PF: predicated region fallthrough
CT: control target
= control target key end

     0   :  { %12 = vsyncpa [#allocation4], 0  ;;  %s1076_s0 = inlined_call_operand.vmem [shape: f32[16,512], index: 0, kind: input, shape index: {}]   ;;  %s1077_s1 = inlined_call_operand.vmem [shape: f32[32,16], index: 1, kind: input, shape index: {}]   ;;  %s1078_s2 = inlined_call_operand.vmem [shape: f32[32,1], index: 2, kind: input, shape index: {}]   ;;  %s1079_s3 = inlined_call_operand.vmem [shape: f32[16,32], index: 3, kind: input, shape index: {}]   ;;  %s1080_s4 = inlined_call_operand.vmem [shape: f32[16,1], index: 4, kind: input, shape index: {}]   ;;  %s1081_s5 = inlined_call_operand.vmem [shape: f32[2,16], index: 5, kind: input, shape index: {}]   ;;  %s1082_s6 = inlined_call_operand.vmem [shape: f32[2,1], index: 6, kind: input, shape index: {}]   ;;  %s1083_s7 = inlined_call_operand.hbm [shape: f32[2,512], index: 7, kind: output, shape index: {}]  }
   0x1   :  { %14 = vsyncpa [#allocation4 + $0x1], 0  ;;  %s912_s24 = smov 0   ;;  %s914_s25 = smov 0  }
   0x2   :  { %s916_s26 = smov 0   ;;  %s918_s27 = smov 0  }
   0x3 LB: > { %s721_s28 = sadd.s32 4294967295, %s867_s27   ;;  %s722_s29 = sadd.s32 4294967294, %s867_s27   ;;  %s867_s27 = sphi %s918_s27, %s1089_s27   ;;  %s863_s26 = sphi %s916_s26, %s1088_s26   ;;  %s859_s25 = sphi %s914_s25, %s1087_s25   ;;  %s855_s24 = sphi %s912_s24, %s1086_s24  }
   0x4   : > { %s935_s30 = sadd.s32 1, %s867_s27   ;;  %s27_s8 = sadd.s32 1, %s863_s26 }
   0x5   : > { %s24_s9 = ssub.s32 %s867_s27, %s935_s30  ;;  %p34_p0 = scmp.ne.s32.totalorder %s863_s26, %s859_s25 }
   0x6   : > { %p25_p1 = scmp.eq.s32.totalorder %s24_s9, 0  ;;  %p35_p2 = scmp.eq.s32.totalorder %s867_s27, 0 }
   0x7   : > { %p190_p3 = scmp.eq.s32.totalorder %s721_s28, 1  ;;  %p195_p4 = scmp.ne.s32.totalorder %s859_s25, %s855_s24 }
   0x8   : > { %s948_s10 = scalar_select %p25_p1, %s863_s26, %s27_s8  }
   0x9   : > { %p36_p5 = por %p35_p2, %p34_p0  ;;  %p950_p6 = por %p190_p3, %p34_p0 }
   0xa   : > { %p196_p7 = scmp.eq.s32.totalorder %s722_s29, 1  ;;  %p724_p9 = scmp.ge.s32.totalorder %s867_s27, 2 }
   0xc   : > { %p954_p8 = por %p196_p7, %p195_p4  ;;  %230 = sbr.rel (%p724_p9) target bundleno = 26 (0x1a), region = 40 }
  0x13   : > { %233 = sbr.rel (!%p36_p5) target bundleno = 26 (0x1a), region = 44  ;;  %s235_s13 = sand.u32 (%p36_p5), 1, %s863_s26  }
  0x14   : > { %s744_s14 = sshll.u32 (%p36_p5), %s867_s27, 4  ;;  %s725_s15 = sshll.u32 (%p36_p5), %s235_s13, 5 }
  0x15   : > { %s240_s18 = scalar_lea.vmem (%p36_p5), %s1076_s0, %s744_s14  ;;  %s237_s19 = scalar_lea.vmem (%p36_p5), [#allocation2], %s725_s15 }
  0x16   : > { %v253_v0 = vld [vmem:[%s240_s18] sm:$0xff] (%p36_p5)  ;;  %v255_v1 = vld [vmem:[%s240_s18 + $0x8] sm:$0xff] (%p36_p5) }
  0x17   : > { %v257_v2 = vld [vmem:[%s240_s18 + $0x20] sm:$0xff] (%p36_p5)  ;;  %254 = vst [vmem:[%s237_s19] sm:$0xff] (%p36_p5), %v253_v0  ;;  %256 = vst [vmem:[%s237_s19 + $0x8] sm:$0xff] (%p36_p5), %v255_v1  ;;  %v259_v3 = vld [vmem:[%s240_s18 + $0x28] sm:$0xff] (%p36_p5) }
  0x18   : > { %258 = vst [vmem:[%s237_s19 + $0x10] sm:$0xff] (%p36_p5), %v257_v2  ;;  %260 = vst [vmem:[%s237_s19 + $0x18] sm:$0xff] (%p36_p5), %v259_v3 }
  0x1a PF: > { %p728_p10 = scmp.ge.s32.totalorder %s867_s27, 1  ;;  %p265_p11 = scmp.lt.s32.totalorder %s867_s27, 3 }
  0x1c   : > { %p266_p12 = pnand %p728_p10, %p265_p11 }
  0x1d   : > { %s969_s20 = sand.u32 (!%p266_p12), 1, %s859_s25   ;;  %v869_v4 = vmov (!%p266_p12), 0.0   ;;  %v313_v5 = vld [vmem:[%s1078_s2] sm:$0xff] (!%p266_p12)  ;;  %v870_v6 = vmov (!%p266_p12), 0   ;;  %v315_v7 = vld [vmem:[%s1078_s2 + $0x10] sm:$0xff] (!%p266_p12)  ;;  %v314_v13 = vld [vmem:[%s1078_s2 + $0x8] sm:$0xff] (!%p266_p12) }
  0x1e   : > { %269 = sbr.rel (%p266_p12) target bundleno = 732 (0x2dc), region = 67  ;;  %s729_s21 = sshll.u32 (!%p266_p12), %s969_s20, 5  ;;  %414 = vmatprep.mubr.f32.mxu0 (!%p266_p12), %v869_v4  ;;  %532 = vmatprep.mubr.f32.mxu1 (!%p266_p12), %v869_v4  ;;  %v316_v15 = vld [vmem:[%s1078_s2 + $0x18] sm:$0xff] (!%p266_p12)  ;;  %v309_v16 = vld [vmem:[%s1077_s1] sm:$0xff] (!%p266_p12)  ;;  %vm337_vm0 = vcmask (!%p266_p12), 130048   ;;  %v450_v18 = vld [vmem:[%s1080_s4 + $0x8] sm:$0xff] (!%p266_p12) }
  0x1f   : > { %803 = vset.pattern.permute.xlu0 (!%p266_p12), %v870_v6  ;;  %804 = vset.pattern.permute.xlu1 (!%p266_p12), %v870_v6  ;;  %s274_s9 = scalar_lea.vmem (!%p266_p12), [#allocation2], %s729_s21  ;;  %v449_v17 = vld [vmem:[%s1080_s4] sm:$0xff] (!%p266_p12)  ;;  %v310_v19 = vld [vmem:[%s1077_s1 + $0x8] sm:$0xff] (!%p266_p12)  ;;  %v311_v21 = vld [vmem:[%s1077_s1 + $0x10] sm:$0xff] (!%p266_p12)  ;;  %vm461_vm1 = vcmask (!%p266_p12), 261120   ;;  %s730_s8 = sshll.u32 (!%p266_p12), %s969_s20, 2 }
  0x20   : > { %v306_v8 = vld [vmem:[%s274_s9 + $0x8] sm:$0xff] (!%p266_p12)  ;;  %v308_v9 = vld [vmem:[%s274_s9 + $0x18] sm:$0xff] (!%p266_p12)  ;;  %v305_v10 = vld [vmem:[%s274_s9] sm:$0xff] (!%p266_p12)  ;;  %319 = vperm.xlu0 (!%p266_p12), %803, %v313_v5   ;;  %329 = vperm.xlu1 (!%p266_p12), %804, %v315_v7   ;;  %s302_s13 = scalar_lea.vmem (!%p266_p12), [#allocation3], %s730_s8  ;;  %s643_s18 = scalar_lea.sflag (!%p266_p12), [#allocation4], %s969_s20 }
  0x21   : > { %v746_v11 = vpack.c.bf16 (!%p266_p12), %v308_v9, %v306_v8  ;;  %v307_v12 = vld [vmem:[%s274_s9 + $0x10] sm:$0xff] (!%p266_p12)  ;;  %v550_v20 = vld [vmem:[%s1082_s6] sm:$0x3] (!%p266_p12)  ;;  %v312_v22 = vld [vmem:[%s1077_s1 + $0x18] sm:$0xff] (!%p266_p12)  ;;  %s745_s9 = sshll.u32 (!%p266_p12), %s721_s28, 6  ;;  %s657_s14 = sshll.u32 (!%p266_p12), %s302_s13, 4  ;;  %s1034_s14 = int_to_ptr.vmem [resolvable:$true] %s657_s14 }
  0x22   : > { %v748_v14 = vpack.c.bf16 (!%p266_p12), %v307_v12, %v305_v10  ;;  %v447_v55 = vld [vmem:[%s1079_s3] sm:$0xff] (!%p266_p12)  ;;  %v448_v56 = vld [vmem:[%s1079_s3 + $0x8] sm:$0xff] (!%p266_p12)  ;;  %s1032_s17 = scalar_lea.hbm (!%p266_p12), %s1083_s7, %s745_s9  ;;  %s805_s19 = scalar_lea.vmem (!%p266_p12), %s1034_s14, 64 }
  0x23   : > { %747 = vmatprep.subr.bf16.mxu0 (!%p266_p12), %v746_v11  ;;  %p806_p13 = scmp.ne.s32.totalorder (!%p266_p12), %s1034_s14, %s805_s19  ;;  %s871_s28 = smov (!%p266_p12), [#allocation3]  }
  0x24   : > { %749 = vmatpush1.bf16.msra.mxu0 (!%p266_p12), %v748_v14  ;;  %324 = vperm.xlu0 (!%p266_p12), %803, %v314_v13   ;;  %s809_s21 = sshll.u32 (!%p266_p12), %s871_s28, 4  ;;  %s810_s21 = int_to_ptr.vmem [resolvable:$false] %s809_s21 }
  0x25   : > { %334 = vperm.xlu1 %804, %v316_v15   ;;  %p807_p0 = pnand %p806_p13, %p950_p6  ;;  %s811_s22 = scalar_lea.vmem %s810_s21, 128 }
  0x26   : > { %p812_p2 = scmp.lt.s32.totalorder %s1034_s14, %s810_s21  ;;  %p813_p3 = scmp.lt.s32.totalorder %s811_s22, %s805_s19 }
  0x27   : > { %731 = vmatmul.mubr.msk.f32.vlgmr.msra.gmra.mrb[0].mxu0 %vm337_vm0, %v309_v16  ;;  %p808_p1 = pneg %p807_p0 }
  0x28   : > { %420 = vmatprep.mubr.f32.mxu0 %v869_v4  ;;  %453 = vperm.xlu0 %803, %v449_v17   ;;  %p814_p4 = por %p813_p3, %p812_p2 }
  0x29   : > { %458 = vperm.xlu1 %804, %v450_v18  }
  0x2a   : > { %p815_p5 = pnand %p814_p4, %p808_p1 }
  0x2b   : > { %732 = vmatmul.mubr.msk.f32.gmra.mrb[2].mxu0 %vm337_vm0, %v310_v19 }
  0x2c   : > { %426 = vmatprep.mubr.f32.mxu0 %v869_v4  ;;  %553 = vperm.xlu0 %803, %v550_v20  }
  0x2f   : > { %733 = vmatmul.mubr.msk.f32.gmra.mrb[4].mxu0 %vm337_vm0, %v311_v21 }
  0x30   : > { %432 = vmatprep.mubr.f32.mxu0 %v869_v4 }
  0x33   : > { %734 = vmatmul.mubr.msk.f32.gmra.mrb[6].mxu0 %vm337_vm0, %v312_v22 }
  0x9f   : > { %v320_v23 = vpop.permute.xlu0 %319  ;;  %v330_v32 = vpop.permute.xlu1 %329 }
  0xa3   : > { %v325_v27 = vpop.permute.xlu0 %324 }
  0xa4   : > { %v335_v43 = vpop.permute.xlu1 %334 }
  0xa7   : > { %v454_v59 = vpop.permute.xlu0 %453 }
  0xa8   : > { %v459_v61 = vpop.permute.xlu1 %458 }
  0xab   : > { %v554_v10 = vpop.permute.xlu0 %553 }
  0xfa   : > { %v416_v24 = vpop.f32.mrb[0].mxu0 }
  0xfb   : > { %v418_v25 = vpop.f32.mrb[1].mxu0  ;;  %v417_v26 = vadd.f32 %v416_v24, %v320_v23 }
  0xfc   : > { %v419_v28 = vadd.f32 %v418_v25, %v320_v23 }
  0xfd   : > { %v439_v34 = vmax.f32 %v417_v26, 0.0 }
  0xfe   : > { %v422_v29 = vpop.f32.mrb[2].mxu0  ;;  %v440_v36 = vmax.f32 %v419_v28, 0.0 }
  0xff   : > { %v423_v30 = vadd.f32 %v422_v29, %v325_v27  ;;  %v424_v31 = vpop.f32.mrb[3].mxu0 }
 0x100   : > { %v425_v33 = vadd.f32 %v424_v31, %v325_v27 }
 0x101   : > { %v441_v35 = vmax.f32 %v423_v30, 0.0 }
 0x102   : > { %v442_v37 = vmax.f32 %v425_v33, 0.0  ;;  %v428_v38 = vpop.f32.mrb[4].mxu0 }
 0x103   : > { %v430_v39 = vpop.f32.mrb[5].mxu0  ;;  %v752_v40 = vpack.c.bf16 %v441_v35, %v439_v34  ;;  %v429_v42 = vadd.f32 %v428_v38, %v330_v32 }
 0x104   : > { %v750_v41 = vpack.c.bf16 %v442_v37, %v440_v36  ;;  %v431_v44 = vadd.f32 %v430_v39, %v330_v32 }
 0x105   : > { %v443_v49 = vmax.f32 %v429_v42, 0.0 }
 0x106   : > { %v434_v45 = vpop.f32.mrb[6].mxu0  ;;  %751 = vmatprep.subr.bf16.mxu1 %v750_v41  ;;  %v444_v51 = vmax.f32 %v431_v44, 0.0 }
 0x107   : > { %v435_v46 = vadd.f32 %v434_v45, %v335_v43  ;;  %v436_v47 = vpop.f32.mrb[7].mxu0  ;;  %753 = vmatpush1.bf16.msra.mxu1 %v752_v40 }
 0x108   : > { %v437_v48 = vadd.f32 %v436_v47, %v335_v43 }
 0x109   : > { %v445_v50 = vmax.f32 %v435_v46, 0.0 }
 0x10a   : > { %v446_v52 = vmax.f32 %v437_v48, 0.0 }
 0x10b   : > { %v756_v53 = vpack.c.bf16 %v445_v50, %v443_v49 }
 0x10c   : > { %v754_v54 = vpack.c.bf16 %v446_v52, %v444_v51 }
 0x10e   : > { %755 = vmatprep.subr.bf16.mxu1 %v754_v54 }
 0x10f   : > { %757 = vmatpush1.bf16.msra.mxu1 %v756_v53 }
 0x112   : > { %735 = vmatmul.mubr.msk.f32.vlgmr.msra.gmra.mrb[0].mxu1 %vm461_vm1, %v447_v55 }
 0x113   : > { %538 = vmatprep.mubr.f32.mxu1 %v869_v4 }
 0x116   : > { %736 = vmatmul.mubr.msk.f32.gmra.mrb[2].mxu1 %vm461_vm1, %v448_v56 }
 0x117   : > { %623 = vmatprep.mubr.f32.mxu1 %v869_v4  ;;  %v549_v4 = vld [vmem:[%s1081_s5] sm:$0x3] }
 0x1e5   : > { %v534_v57 = vpop.f32.mrb[0].mxu1 }
 0x1e6   : > { %v536_v58 = vpop.f32.mrb[1].mxu1  ;;  %v535_v60 = vadd.f32 %v534_v57, %v454_v59 }
 0x1e7   : > { %v537_v62 = vadd.f32 %v536_v58, %v454_v59 }
 0x1e8   : > { %v545_v3 = vmax.f32 %v535_v60, 0.0 }
 0x1e9   : > { %v540_v63 = vpop.f32.mrb[2].mxu1  ;;  %v546_v6 = vmax.f32 %v537_v62, 0.0 }
 0x1ea   : > { %v541_v0 = vadd.f32 %v540_v63, %v459_v61  ;;  %v542_v1 = vpop.f32.mrb[3].mxu1 }
 0x1eb   : > { %v543_v2 = vadd.f32 %v542_v1, %v459_v61 }
 0x1ec   : > { %v547_v5 = vmax.f32 %v541_v0, 0.0 }
 0x1ed   : > { %v548_v7 = vmax.f32 %v543_v2, 0.0 }
 0x1ee   : > { %v760_v8 = vpack.c.bf16 %v547_v5, %v545_v3 }
 0x1ef   : > { %v758_v9 = vpack.c.bf16 %v548_v7, %v546_v6 }
 0x1f1   : > { %759 = vmatprep.subr.bf16.mxu1 %v758_v9 }
 0x1f2   : > { %761 = vmatpush1.bf16.msra.mxu1 %v760_v8 }
 0x1f5   : > { %737 = vmatmul.mubr.msk.f32.vlgmr.msra.gmra.mrb[4].mxu1 %vm337_vm0, %v549_v4 }
 0x2c8   : > { %v625_v11 = vpop.f32.mrb[4].mxu1 }
 0x2c9   : > { %v626_v12 = vadd.f32 %v625_v11, %v554_v10  ;;  %v627_v13 = vpop.f32.mrb[5].mxu1 }
 0x2ca   : > { %v628_v14 = vadd.f32 %v627_v13, %v554_v10 }
 0x2cc   : > { %v632_v15 = vcombine.low %v626_v12, %v628_v14 }
 0x2ce   : > { %738 = vst.sshfl [vmem:[%s302_s13] sm:$0x33 pattern:$0x76325410] %v632_v15 }
 0x2cf   : > { %818 = shalt.err (!%p815_p5)
}
 0x2d0   : > { %s819_s20 = scalar_lea.hbm %s1032_s17, 64  ;;  %s823_s8 = scalar_lea.hbm %s1083_s7, 128 }
 0x2d1   : > { %p820_p7 = scmp.ne.s32.totalorder %s1032_s17, %s819_s20  ;;  %p824_p12 = scmp.lt.u32.totalorder %s1032_s17, %s1083_s7 }
 0x2d2   : > { %p825_p13 = scmp.lt.u32.totalorder %s823_s8, %s819_s20  ;;  %p827_p1 = scmp.lt.u32.totalorder %s819_s20, %s1032_s17 }
 0x2d3   : > { %p821_p10 = pnand %p820_p7, %p950_p6 }
 0x2d4   : > { %p826_p0 = por %p825_p13, %p824_p12 }
 0x2d5   : > { %p822_p11 = pneg %p821_p10 }
 0x2d6   : > { %p828_p2 = por %p827_p1, %p826_p0 }
 0x2d8   : > { %p829_p3 = pnand %p828_p2, %p822_p11 }
 0x2da   : > { %832 = shalt.err (!%p829_p3)
}
 0x2db   : > { %762 = dma.vmem_to_hbm [thread:$0]  (%p950_p6), %s1034_s14, 64, %s1032_s17, %s643_s18  }
 0x2dc PF: > { %s669_s15 = sand.u32 1, %s855_s24   ;;  %p765_p4 = pnand %p724_p9, %p954_p8 }
 0x2dd   : > { %s670_s16 = scalar_lea.sflag [#allocation4], %s669_s15 }
 0x2de   : > { %850 = dma.done.wait (!%p765_p4), %s670_s16, 64  }
 0x2df   : > { %852 = vsyncadd (!%p765_p4), %s670_s16, 4294967232  ;;  %p17_p5 = scmp.ge.s32.totalorder %s935_s30, 4   ;;  %s1086_s24 = smov %s859_s25 }
 0x2e0   : > { %s1087_s25 = smov %s863_s26  ;;  %s1088_s26 = smov %s948_s10 }
 0x2e1   : > { %s1089_s27 = smov %s935_s30  ;;  %19 = sbr.rel (!%p17_p5) target bundleno = 3 (0x3), region = 111 }
 0x2e8   :  { %675 = vsyncpa [#allocation4], 1 }
 0x2e9   :  { %677 = vsyncpa [#allocation4 + $0x1], 1 }

</bundles_post_ra>
